<compile_context>
chip_gen: v7x
topology: tpu7x:2x2x1
jax: 0.10.0
libtpu: 0.0.40
codegen_flags: <defaults>
</compile_context>

<pallas_src>
import functools

import jax
import jax.numpy as jnp
from jax.experimental import pallas as pl
from jax.experimental.pallas import tpu as pltpu


def _round_up(x, m):
    return (x + m - 1) // m * m


def _sublane_tile(dtype):
    # Minimum sublane tile: 8 for 4-byte, 16 for 2-byte, 32 for 1-byte dtypes.
    return max(8, 32 // jnp.dtype(dtype).itemsize)


def _device_kind():
    try:
        return jax.devices()[0].device_kind.lower()
    except Exception:
        return ""


def _frozen_bn_kernel(params_ref, x_ref, o_ref, *, compute_dtype):
    # params_ref: (tm, 2) in compute dtype; column 0 = scale, column 1 = shift.
    p = params_ref[...]
    scale = p[:, 0:1]               # (tm, 1) -> broadcast along the lane axis
    shift = p[:, 1:2]
    x = x_ref[...].astype(compute_dtype)
    o_ref[...] = (x * scale + shift).astype(o_ref.dtype)


def _choose_tiles(rows, cols, x_itemsize, p_itemsize, sub,
                  target_step_bytes, min_steps=4):
    """Pick (tm, tn) from PADDED VMEM bytes of one grid step (x in + x out +
    packed params), keeping the double-buffered footprint inside the budget."""
    padded_cols = _round_up(cols, 128)

    def step_row_bytes(tn_pad):
        # Padded bytes one row contributes to a grid step (in + out + params).
        return 2 * tn_pad * x_itemsize + 128 * p_itemsize

    # Column tile: full width if even a minimum-height strip fits the budget,
    # otherwise the largest multiple of 128 lanes that does.
    if sub * step_row_bytes(padded_cols) <= target_step_bytes:
        tn, tn_pad = cols, padded_cols
    else:
        lanes = (target_step_bytes // sub - 128 * p_itemsize) // (2 * x_itemsize)
        tn = max(128, (lanes // 128) * 128)
        tn_pad = tn

    # Row tile: largest multiple of the sublane tile that fits the step budget.
    tm = max(sub, (target_step_bytes // step_row_bytes(tn_pad)) // sub * sub)
    if tm >= rows or rows <= sub:
        tm = rows                   # full extent: always a legal block dim
    n_r, n_c = pl.cdiv(rows, tm), pl.cdiv(cols, tn)

    # Ensure >= min_steps grid steps (and an even row-step count) whenever the
    # array spans more than one block: pipeline overlap + v7x 2-TC sharding.
    if not (tm >= rows and tn >= cols):
        max_n_r = pl.cdiv(rows, sub) if rows > sub else 1
        want_r = min(max_n_r, max(n_r, -(-min_steps // n_c)))
        if want_r > 1 and want_r % 2 == 1 and want_r + 1 <= max_n_r:
            want_r += 1             # even split across the 2 TensorCores (v7x)
        if want_r > n_r:
            tm = max(sub, _round_up(-(-rows // want_r), sub))
            if tm >= rows:
                tm = rows
    return tm, tn


def frozen_batch_norm(x_nchw, weight, bias, running_mean=None, running_var=None,
                      eps=1e-5, track_running_stats=True):
    """x_nchw: (N, C, H, W). weight/bias/running_*: (C,). Returns (N, C, H, W)."""
    N, C, H, W = x_nchw.shape
    rows, cols = N * C, H * W

    # Fold running stats once in the wrapper (O(C), negligible) -- in f32.
    if track_running_stats:
        scale = weight.astype(jnp.float32) * jax.lax.rsqrt(
            running_var.astype(jnp.float32) + jnp.float32(eps))
        shift = bias.astype(jnp.float32) - running_mean.astype(jnp.float32) * scale
    else:
        scale = weight.astype(jnp.float32)
        shift = bias.astype(jnp.float32)

    kind = _device_kind()
    is_v7 = "v7" in kind
    # bf16 VPU exists on v6e/v7x; v5e and older compute in f32.
    bf16_ok = not any(t in kind for t in ("v2", "v3", "v4", "v5"))
    if x_nchw.dtype == jnp.bfloat16 and bf16_ok:
        compute_dtype = jnp.bfloat16
    else:
        compute_dtype = jnp.float32

    # Pack per-row (= per (n, c) pair) scale/shift into one (N*C, 2) slab.
    params = jnp.stack(
        [jnp.tile(scale, N), jnp.tile(shift, N)], axis=-1).astype(compute_dtype)

    # NCHW -> (N*C, H*W): contiguous (free) reshape; spatial on the lane axis.
    # If H*W is not a multiple of 128 the last lane group uses masked stores;
    # padding the spatial axis would cost an extra HBM pass, so on this
    # HBM-bound kernel we accept the masked tail instead.
    x2 = x_nchw.reshape(rows, cols)

    # Per-step (in + out + params, padded) budget and scoped-VMEM limit.
    # Double-buffered: 2 * step budget stays well under the limit on all gens.
    target_step_bytes = (12 << 20) if is_v7 else (8 << 20)
    vmem_limit_bytes = (48 << 20) if is_v7 else (32 << 20)

    sub = max(_sublane_tile(x2.dtype), _sublane_tile(compute_dtype))
    tm, tn = _choose_tiles(rows, cols, x2.dtype.itemsize,
                           jnp.dtype(compute_dtype).itemsize, sub,
                           target_step_bytes)
    grid = (pl.cdiv(rows, tm), pl.cdiv(cols, tn))

    param_spec = pl.BlockSpec((tm, 2), lambda i, j: (i, 0))
    data_spec = pl.BlockSpec((tm, tn), lambda i, j: (i, j))

    out2 = pl.pallas_call(
        functools.partial(_frozen_bn_kernel, compute_dtype=compute_dtype),
        out_shape=jax.ShapeDtypeStruct((rows, cols), x2.dtype),
        grid_spec=pltpu.PrefetchScalarGridSpec(
            num_scalar_prefetch=0,
            grid=grid,
            in_specs=[param_spec, data_spec],
            out_specs=data_spec,
        ),
        compiler_params=pltpu.CompilerParams(
            # Both grid axes are independent -> shardable across TCs (v7x).
            dimension_semantics=("parallel", "parallel"),
            vmem_limit_bytes=vmem_limit_bytes,
        ),
    )(params, x2)

    return out2.reshape(N, C, H, W)


if __name__ == "__main__":
    key = jax.random.PRNGKey(0)
    k_x, k_w = jax.random.split(key)

    N, C, H, W = 2, 4, 16, 16
    eps = 1e-5

    x = jax.random.normal(k_x, (N, C, H, W), dtype=jnp.float32)

    # Deterministic parameter init mirroring _FrozenBatchNorm.reset_parameters():
    #   weight ~ U[0,1), bias = 0, running_mean = 0, running_var = 1
    weight = jax.random.uniform(k_w, (C,), dtype=jnp.float32)
    bias = jnp.zeros((C,), dtype=jnp.float32)
    running_mean = jnp.zeros((C,), dtype=jnp.float32)
    running_var = jnp.ones((C,), dtype=jnp.float32)

    out = frozen_batch_norm(x, weight, bias, running_mean, running_var, eps=eps)
    out = jax.block_until_ready(out)

    # Pure-JAX reference check of the frozen-BN math.
    scale = weight / jnp.sqrt(running_var + eps)
    shift = bias - running_mean * scale
    ref = scale.reshape(1, C, 1, 1) * x + shift.reshape(1, C, 1, 1)
    assert jnp.allclose(out, ref, atol=1e-5, rtol=1e-5), "mismatch vs reference"

    print("KERNEL_OK")
</pallas_src>

<mosaic_0001>
module attributes {stable_mosaic.version = 11 : i64} {
  func.func @_frozen_bn_kernel(%arg0: i32, %arg1: i32, %arg2: memref<8x2xf32, #tpu.memory_space<vmem>>, %arg3: memref<8x256xf32, #tpu.memory_space<vmem>>, %arg4: memref<8x256xf32, #tpu.memory_space<vmem>>) attributes {dimension_semantics = [#tpu.dimension_semantics<parallel>, #tpu.dimension_semantics<parallel>], iteration_bounds = array<i64: 1, 1>, scalar_prefetch = 0 : i64, scratch_operands = 0 : i64, tpu.core_type = #tpu.core_type<tc>, window_params = [{transform_indices = @transform_0, window_bounds = array<i64: 8, 2>}, {transform_indices = @transform_1, window_bounds = array<i64: 8, 256>}, {transform_indices = @transform_2, window_bounds = array<i64: 8, 256>}]} {
    %c0 = arith.constant 0 : index
    %c0_0 = arith.constant 0 : index
    %0 = vector.load %arg2[%c0, %c0_0] : memref<8x2xf32, #tpu.memory_space<vmem>>, vector<8x2xf32>
    %1 = vector.extract_strided_slice %0 {offsets = [0, 0], sizes = [8, 1], strides = [1, 1]} : vector<8x2xf32> to vector<8x1xf32>
    %2 = vector.extract_strided_slice %0 {offsets = [0, 1], sizes = [8, 1], strides = [1, 1]} : vector<8x2xf32> to vector<8x1xf32>
    %c0_1 = arith.constant 0 : index
    %c0_2 = arith.constant 0 : index
    %3 = vector.load %arg3[%c0_1, %c0_2] : memref<8x256xf32, #tpu.memory_space<vmem>>, vector<8x256xf32>
    %4 = vector.broadcast %1 : vector<8x1xf32> to vector<8x256xf32>
    %5 = arith.mulf %3, %4 : vector<8x256xf32>
    %6 = vector.broadcast %2 : vector<8x1xf32> to vector<8x256xf32>
    %7 = arith.addf %5, %6 : vector<8x256xf32>
    %c0_3 = arith.constant 0 : index
    %c0_4 = arith.constant 0 : index
    %8 = vector.load %arg4[%c0_3, %c0_4] : memref<8x256xf32, #tpu.memory_space<vmem>>, vector<8x256xf32>
    tpu.vector_store %arg4[%c0_3, %c0_4], %7 {strides = array<i32>} : memref<8x256xf32, #tpu.memory_space<vmem>>, vector<8x256xf32>,
    return
  }
  func.func @transform_0(%arg0: i32, %arg1: i32) -> (i32, i32) {
    %c0_i32 = arith.constant 0 : i32
    %c0_i32_0 = arith.constant 0 : i32
    return %arg0, %c0_i32 : i32, i32
  }
  func.func @transform_1(%arg0: i32, %arg1: i32) -> (i32, i32) {
    %c0_i32 = arith.constant 0 : i32
    return %arg0, %arg1 : i32, i32
  }
  func.func @transform_2(%arg0: i32, %arg1: i32) -> (i32, i32) {
    %c0_i32 = arith.constant 0 : i32
    return %arg0, %arg1 : i32, i32
  }
}

</mosaic_0001>

<bundles_post_ra>
// kernel: tpu_custom_call.1
= control target key start
LH: loop header
LB: loop body
LE: loop exit
PB: predicated region body
PF: predicated region fallthrough
CT: control target
= control target key end

     0   :  { %7 = vsyncpa [#allocation3], 0  ;;  %s157_s0 = inlined_call_operand.vmem [shape: f32[8,2], index: 0, kind: input, shape index: {}]   ;;  %s158_s1 = inlined_call_operand.hbm [shape: f32[8,256], index: 1, kind: input, shape index: {}]   ;;  %s159_s2 = inlined_call_operand.hbm [shape: f32[8,256], index: 2, kind: output, shape index: {}]  }
   0x1   :  { %8 = vsyncpa [#allocation4], 0  ;;  %s111_s9 = smov [#allocation2]   ;;  %s63_s13 = scalar_lea.hbm %s158_s1, 256 }
   0x2   :  { %s17_s10 = sshll.u32 %s111_s9, 4  ;;  %p64_p0 = scmp.ne.s32.totalorder %s158_s1, %s63_s13  ;;  %s18_s10 = int_to_ptr.vmem [resolvable:$true] %s17_s10 }
   0x3   :  { %p67_p1 = scmp.lt.u32.totalorder %s63_s13, %s158_s1 }
   0x5   :  { %p69_p2 = pnand %p67_p1, %p64_p0 }
   0x7   :  { %72 = shalt.err (!%p69_p2)
}
   0x8   :  { %s73_s18 = scalar_lea.vmem %s18_s10, 256  ;;  %p78_p4 = scmp.lt.s32.totalorder %s18_s10, %s18_s10 }
   0x9   :  { %p74_p3 = scmp.ne.s32.totalorder %s18_s10, %s73_s18  ;;  %p79_p5 = scmp.lt.s32.totalorder %s73_s18, %s73_s18 }
   0xb   :  { %p80_p6 = por %p79_p5, %p78_p4 }
   0xd   :  { %p81_p7 = pnand %p80_p6, %p74_p3 }
   0xf   :  { %84 = shalt.err (!%p81_p7)
}
  0x10   :  { %20 = dma.hbm_to_vmem [thread:$0]  %s158_s1, 256, %s18_s10, [#allocation3]  }
  0x11   :  { %107 = dma.done.wait [#allocation3], 256  }
  0x12   :  { %108 = vsyncadd [#allocation3], 4294967040  ;;  %v112_v0 = vmov 0   ;;  %v24_v1 = vld [vmem:[%s157_s0] sm:$0xff]  ;;  %v113_v2 = vmov 1   ;;  %v26_v5 = vld [vmem:[#allocation2 + $0x8] sm:$0xff] }
  0x13   :  { %61 = vset.pattern.permute.xlu0 %v112_v0  ;;  %v25_v4 = vld [vmem:[#allocation2] sm:$0xff]  ;;  %s114_s23 = smov [#allocation5]  }
  0x14   :  { %29 = vperm.xlu0 %61, %v24_v1   ;;  %s48_s24 = sshll.u32 %s114_s23, 4  ;;  %s49_s24 = int_to_ptr.vmem [resolvable:$true] %s48_s24 }
  0x15   :  { %s85_s1 = scalar_lea.vmem %s49_s24, 256  ;;  %p90_p9 = scmp.lt.s32.totalorder %s49_s24, %s49_s24 }
  0x16   :  { %p86_p8 = scmp.ne.s32.totalorder %s49_s24, %s85_s1  ;;  %p91_p10 = scmp.lt.s32.totalorder %s85_s1, %s85_s1 }
  0x18   :  { %62 = vset.pattern.permute.xlu0 %v113_v2  ;;  %p92_p11 = por %p91_p10, %p90_p9 }
  0x19   :  { %35 = vperm.xlu0 %62, %v24_v1  }
  0x1a   :  { %p93_p12 = pnand %p92_p11, %p86_p8 }
  0x93   :  { %v30_v3 = vpop.permute.xlu0 %29 }
  0x94   :  { %v32_v6 = vmul.f32 %v30_v3, %v25_v4  ;;  %v33_v7 = vmul.f32 %v30_v3, %v26_v5 }
  0x98   :  { %v36_v8 = vpop.permute.xlu0 %35 }
  0x99   :  { %v38_v9 = vadd.f32 %v36_v8, %v32_v6  ;;  %v39_v10 = vadd.f32 %v36_v8, %v33_v7 }
  0x9b   :  { %40 = vst [vmem:[#allocation5] sm:$0xff] %v38_v9  ;;  %41 = vst [vmem:[#allocation5 + $0x8] sm:$0xff] %v39_v10 }
  0x9c   :  { %96 = shalt.err (!%p93_p12)
}
  0x9d   :  { %s97_s26 = scalar_lea.hbm %s159_s2, 256 }
  0x9e   :  { %p98_p13 = scmp.ne.s32.totalorder %s159_s2, %s97_s26  ;;  %p101_p0 = scmp.lt.u32.totalorder %s97_s26, %s159_s2 }
  0xa0   :  { %p103_p1 = pnand %p101_p0, %p98_p13 }
  0xa2   :  { %106 = shalt.err (!%p103_p1)
}
  0xa3   :  { %51 = dma.vmem_to_hbm [thread:$0]  %s49_s24, 256, %s159_s2, [#allocation4]  }
  0xa4   :  { %109 = dma.done.wait [#allocation4], 256  }
  0xa5   :  { %110 = vsyncadd [#allocation4], 4294967040 }
  0xa6   :  { %55 = vsyncpa [#allocation3], 1 }
  0xa7   :  { %56 = vsyncpa [#allocation4], 1 }

</bundles_post_ra>
